<compile_context>
chip_gen: v5e
topology: v5e:2x2
jax: 0.10.0
libtpu: 0.0.40
codegen_flags: <defaults>
</compile_context>

<pallas_src>
import functools

import jax
import jax.numpy as jnp
from jax.experimental import pallas as pl
from jax.experimental.pallas import tpu as pltpu

LANE = 128  # TPU lane width


def qnet_kernel(x_ref, w1_ref, b1_ref, w2_ref, b2_ref, w3_ref, b3_ref, o_ref):
    # One batch-tile of the whole 3-layer MLP (weights are VMEM-resident).
    x = x_ref[...]
    h1 = jnp.dot(x.astype(jnp.bfloat16), w1_ref[...],
                 preferred_element_type=jnp.float32) + b1_ref[...]
    h1 = jnp.maximum(h1, 0.0)
    h2 = jnp.dot(h1.astype(jnp.bfloat16), w2_ref[...],
                 preferred_element_type=jnp.float32) + b2_ref[...]
    h2 = jnp.maximum(h2, 0.0)
    q = jnp.dot(h2.astype(jnp.bfloat16), w3_ref[...],
                preferred_element_type=jnp.float32) + b3_ref[...]
    o_ref[...] = q.astype(o_ref.dtype)   # lane-dense (TB, 128) unmasked store


@functools.partial(jax.jit, static_argnames=("tb",))
def qnet_forward(state, params, *, tb=512):
    """state: (B, state_dim) f32.  params: dict of w{1,2,3} (bf16), b{1,2,3} (f32)."""
    w1, b1 = params["w1"], params["b1"]
    w2, b2 = params["w2"], params["b2"]
    w3, b3 = params["w3"], params["b3"]
    B, state_dim = state.shape
    action_dim = w3.shape[1]

    # Lane-dense output: pad last layer out to a multiple of 128 lanes.
    out_pad = pl.cdiv(action_dim, LANE) * LANE
    w3p = jnp.pad(w3, ((0, 0), (0, out_pad - action_dim)))
    b3p = jnp.pad(b3, ((0, 0), (0, out_pad - action_dim)))

    # Batch tiling: cap the tile at the sublane-padded batch, pad B up to a
    # whole number of tiles.
    tb = min(tb, pl.cdiv(B, 8) * 8)
    b_pad = pl.cdiv(B, tb) * tb
    if b_pad != B:
        state = jnp.pad(state, ((0, b_pad - B), (0, 0)))
    n_tiles = b_pad // tb

    # Full-array blocks with constant index_map -> fetched once, VMEM-resident.
    const = lambda a: pl.BlockSpec(a.shape, lambda i: (0,) * a.ndim)

    out = pl.pallas_call(
        qnet_kernel,
        out_shape=jax.ShapeDtypeStruct((b_pad, out_pad), jnp.float32),
        grid=(n_tiles,),
        in_specs=[
            pl.BlockSpec((tb, state_dim), lambda i: (i, 0)),
            const(w1), const(b1),
            const(w2), const(b2),
            const(w3p), const(b3p),
        ],
        out_specs=pl.BlockSpec((tb, out_pad), lambda i: (i, 0)),
        compiler_params=pltpu.CompilerParams(
            dimension_semantics=("parallel",),     # megacore batch sharding (v7x)
            vmem_limit_bytes=64 * 1024 * 1024,     # explicit budget; safe on v7x
        ),
    )(state, w1, b1, w2, b2, w3p, b3p)
    return out[:B, :action_dim]


def init_qnet_params(key, state_dim, action_dim, net_width,
                     weight_dtype=jnp.bfloat16):
    """Mimics PyTorch nn.Linear default init U(-1/sqrt(fan_in), +)."""
    hidden2 = net_width // 2
    dims = [(state_dim, net_width), (net_width, hidden2), (hidden2, action_dim)]
    params = {}
    for i, (fan_in, fan_out) in enumerate(dims, start=1):
        key, kw, kb = jax.random.split(key, 3)
        bound = 1.0 / jnp.sqrt(jnp.float32(fan_in))
        w = jax.random.uniform(kw, (fan_in, fan_out), jnp.float32, -bound, bound)
        params[f"w{i}"] = w.astype(weight_dtype)   # bf16: MXU-native, half the DMA
        params[f"b{i}"] = jax.random.uniform(      # bias kept f32 (VPU add path)
            kb, (1, fan_out), jnp.float32, -bound, bound)
    return params


def qnet_reference(state, params):
    # Pure-JAX reference with identical dtype behaviour (bf16 MXU operands,
    # f32 accumulation / elementwise).
    def lin(x, w, b):
        return jnp.dot(x.astype(w.dtype), w,
                       preferred_element_type=jnp.float32) + b
    h1 = jnp.maximum(lin(state, params["w1"], params["b1"]), 0.0)
    h2 = jnp.maximum(lin(h1, params["w2"], params["b2"]), 0.0)
    return lin(h2, params["w3"], params["b3"])


if __name__ == "__main__":
    key = jax.random.PRNGKey(0)
    state_dim, action_dim, net_width = 8, 4, 32

    key, kp, kx1, kx2 = jax.random.split(key, 4)
    params = init_qnet_params(kp, state_dim, action_dim, net_width)

    # Small-batch case (single tile).
    batch = 8
    state = jax.random.normal(kx1, (batch, state_dim), jnp.float32)
    q = jax.block_until_ready(qnet_forward(state, params))
    q_ref = qnet_reference(state, params)
    assert q.shape == (batch, action_dim)
    assert jnp.allclose(q, q_ref, atol=1e-4, rtol=1e-4), "mismatch vs reference (B=8)"

    # Larger, non-multiple batch to exercise the tiled/padded grid path.
    batch2 = 300
    state2 = jax.random.normal(kx2, (batch2, state_dim), jnp.float32)
    q2 = jax.block_until_ready(qnet_forward(state2, params, tb=128))
    q2_ref = qnet_reference(state2, params)
    assert q2.shape == (batch2, action_dim)
    assert jnp.allclose(q2, q2_ref, atol=1e-4, rtol=1e-4), "mismatch vs reference (B=300)"

    print("KERNEL_OK")
</pallas_src>

<mosaic_0001>
module attributes {stable_mosaic.version = 11 : i64} {
  func.func @qnet_kernel(%arg0: i32, %arg1: memref<8x8xf32, #tpu.memory_space<vmem>>, %arg2: memref<8x32xbf16, #tpu.memory_space<vmem>>, %arg3: memref<1x32xf32, #tpu.memory_space<vmem>>, %arg4: memref<32x16xbf16, #tpu.memory_space<vmem>>, %arg5: memref<1x16xf32, #tpu.memory_space<vmem>>, %arg6: memref<16x128xbf16, #tpu.memory_space<vmem>>, %arg7: memref<1x128xf32, #tpu.memory_space<vmem>>, %arg8: memref<8x128xf32, #tpu.memory_space<vmem>>) attributes {dimension_semantics = [#tpu.dimension_semantics<parallel>], iteration_bounds = array<i64: 1>, scalar_prefetch = 0 : i64, scratch_operands = 0 : i64, tpu.core_type = #tpu.core_type<tc>, window_params = [{transform_indices = @transform_0, window_bounds = array<i64: 8, 8>}, {pipeline_mode = #tpu.pipeline_mode<synchronous>, transform_indices = @transform_1, window_bounds = array<i64: 8, 32>}, {pipeline_mode = #tpu.pipeline_mode<synchronous>, transform_indices = @transform_2, window_bounds = array<i64: 1, 32>}, {pipeline_mode = #tpu.pipeline_mode<synchronous>, transform_indices = @transform_3, window_bounds = array<i64: 32, 16>}, {pipeline_mode = #tpu.pipeline_mode<synchronous>, transform_indices = @transform_4, window_bounds = array<i64: 1, 16>}, {pipeline_mode = #tpu.pipeline_mode<synchronous>, transform_indices = @transform_5, window_bounds = array<i64: 16, 128>}, {pipeline_mode = #tpu.pipeline_mode<synchronous>, transform_indices = @transform_6, window_bounds = array<i64: 1, 128>}, {transform_indices = @transform_7, window_bounds = array<i64: 8, 128>}]} {
    %c0 = arith.constant 0 : index
    %c0_0 = arith.constant 0 : index
    %0 = vector.load %arg1[%c0, %c0_0] : memref<8x8xf32, #tpu.memory_space<vmem>>, vector<8x8xf32>
    %1 = arith.truncf %0 : vector<8x8xf32> to vector<8x8xbf16>
    %c0_1 = arith.constant 0 : index
    %c0_2 = arith.constant 0 : index
    %2 = vector.load %arg2[%c0_1, %c0_2] : memref<8x32xbf16, #tpu.memory_space<vmem>>, vector<8x32xbf16>
    %cst = arith.constant dense<0.000000e+00> : vector<8x32xf32>
    %3 = tpu.matmul %1, %2, %cst {dimension_numbers = #tpu.dot_dimension_numbers<[1], [0], [0], [1], [0, 0, 1, 1], [], []>} : vector<8x8xbf16>, vector<8x32xbf16>, vector<8x32xf32> -> vector<8x32xf32>
    %c0_3 = arith.constant 0 : index
    %c0_4 = arith.constant 0 : index
    %4 = vector.load %arg3[%c0_3, %c0_4] : memref<1x32xf32, #tpu.memory_space<vmem>>, vector<1x32xf32>
    %5 = vector.broadcast %4 : vector<1x32xf32> to vector<8x32xf32>
    %6 = arith.addf %3, %5 : vector<8x32xf32>
    %cst_5 = arith.constant 0.000000e+00 : f32
    %7 = vector.broadcast %cst_5 : f32 to vector<8x32xf32>
    %8 = arith.maximumf %6, %7 : vector<8x32xf32>
    %9 = arith.truncf %8 : vector<8x32xf32> to vector<8x32xbf16>
    %c0_6 = arith.constant 0 : index
    %c0_7 = arith.constant 0 : index
    %10 = vector.load %arg4[%c0_6, %c0_7] : memref<32x16xbf16, #tpu.memory_space<vmem>>, vector<32x16xbf16>
    %cst_8 = arith.constant dense<0.000000e+00> : vector<8x16xf32>
    %11 = tpu.matmul %9, %10, %cst_8 {dimension_numbers = #tpu.dot_dimension_numbers<[1], [0], [0], [1], [0, 0, 1, 1], [], []>} : vector<8x32xbf16>, vector<32x16xbf16>, vector<8x16xf32> -> vector<8x16xf32>
    %c0_9 = arith.constant 0 : index
    %c0_10 = arith.constant 0 : index
    %12 = vector.load %arg5[%c0_9, %c0_10] : memref<1x16xf32, #tpu.memory_space<vmem>>, vector<1x16xf32>
    %13 = vector.broadcast %12 : vector<1x16xf32> to vector<8x16xf32>
    %14 = arith.addf %11, %13 : vector<8x16xf32>
    %cst_11 = arith.constant 0.000000e+00 : f32
    %15 = vector.broadcast %cst_11 : f32 to vector<8x16xf32>
    %16 = arith.maximumf %14, %15 : vector<8x16xf32>
    %17 = arith.truncf %16 : vector<8x16xf32> to vector<8x16xbf16>
    %c0_12 = arith.constant 0 : index
    %c0_13 = arith.constant 0 : index
    %18 = vector.load %arg6[%c0_12, %c0_13] : memref<16x128xbf16, #tpu.memory_space<vmem>>, vector<16x128xbf16>
    %cst_14 = arith.constant dense<0.000000e+00> : vector<8x128xf32>
    %19 = tpu.matmul %17, %18, %cst_14 {dimension_numbers = #tpu.dot_dimension_numbers<[1], [0], [0], [1], [0, 0, 1, 1], [], []>} : vector<8x16xbf16>, vector<16x128xbf16>, vector<8x128xf32> -> vector<8x128xf32>
    %c0_15 = arith.constant 0 : index
    %c0_16 = arith.constant 0 : index
    %20 = vector.load %arg7[%c0_15, %c0_16] : memref<1x128xf32, #tpu.memory_space<vmem>>, vector<1x128xf32>
    %21 = vector.broadcast %20 : vector<1x128xf32> to vector<8x128xf32>
    %22 = arith.addf %19, %21 : vector<8x128xf32>
    %c0_17 = arith.constant 0 : index
    %c0_18 = arith.constant 0 : index
    %23 = vector.load %arg8[%c0_17, %c0_18] : memref<8x128xf32, #tpu.memory_space<vmem>>, vector<8x128xf32>
    tpu.vector_store %arg8[%c0_17, %c0_18], %22 {strides = array<i32>} : memref<8x128xf32, #tpu.memory_space<vmem>>, vector<8x128xf32>,
    return
  }
  func.func @transform_0(%arg0: i32) -> (i32, i32) {
    %c0_i32 = arith.constant 0 : i32
    %c0_i32_0 = arith.constant 0 : i32
    return %arg0, %c0_i32 : i32, i32
  }
  func.func @transform_1(%arg0: i32) -> (i32, i32) {
    %c0_i32 = arith.constant 0 : i32
    %c0_i32_0 = arith.constant 0 : i32
    %c0_i32_1 = arith.constant 0 : i32
    return %c0_i32, %c0_i32_0 : i32, i32
  }
  func.func @transform_2(%arg0: i32) -> (i32, i32) {
    %c0_i32 = arith.constant 0 : i32
    %c0_i32_0 = arith.constant 0 : i32
    %c0_i32_1 = arith.constant 0 : i32
    return %c0_i32, %c0_i32_0 : i32, i32
  }
  func.func @transform_3(%arg0: i32) -> (i32, i32) {
    %c0_i32 = arith.constant 0 : i32
    %c0_i32_0 = arith.constant 0 : i32
    %c0_i32_1 = arith.constant 0 : i32
    return %c0_i32, %c0_i32_0 : i32, i32
  }
  func.func @transform_4(%arg0: i32) -> (i32, i32) {
    %c0_i32 = arith.constant 0 : i32
    %c0_i32_0 = arith.constant 0 : i32
    %c0_i32_1 = arith.constant 0 : i32
    return %c0_i32, %c0_i32_0 : i32, i32
  }
  func.func @transform_5(%arg0: i32) -> (i32, i32) {
    %c0_i32 = arith.constant 0 : i32
    %c0_i32_0 = arith.constant 0 : i32
    %c0_i32_1 = arith.constant 0 : i32
    return %c0_i32, %c0_i32_0 : i32, i32
  }
  func.func @transform_6(%arg0: i32) -> (i32, i32) {
    %c0_i32 = arith.constant 0 : i32
    %c0_i32_0 = arith.constant 0 : i32
    %c0_i32_1 = arith.constant 0 : i32
    return %c0_i32, %c0_i32_0 : i32, i32
  }
  func.func @transform_7(%arg0: i32) -> (i32, i32) {
    %c0_i32 = arith.constant 0 : i32
    %c0_i32_0 = arith.constant 0 : i32
    return %arg0, %c0_i32 : i32, i32
  }
}

</mosaic_0001>

<bundles_post_ra>
// kernel: qnet_forward.1
= control target key start
LH: loop header
LB: loop body
LE: loop exit
PB: predicated region body
PF: predicated region fallthrough
CT: control target
= control target key end

     0   :  { %vm38_vm0 = vcmask 1043456   ;;  %vm34_vm1 = vcmask 64512   ;;  %vm77_vm2 = vcmask 261120   ;;  %vm108_vm3 = vcmask 130048   ;;  %s218_s1 = inlined_call_operand.vmem [shape: bf16[8,32], index: 1, kind: input, shape index: {}]   ;;  %s219_s0 = inlined_call_operand.vmem [shape: f32[8,8], index: 0, kind: input, shape index: {}]   ;;  %s220_s2 = inlined_call_operand.vmem [shape: f32[1,32], index: 2, kind: input, shape index: {}]   ;;  %s221_s4 = inlined_call_operand.vmem [shape: f32[1,16], index: 4, kind: input, shape index: {}]   ;;  %s222_s3 = inlined_call_operand.vmem [shape: bf16[32,16], index: 3, kind: input, shape index: {}]   ;;  %s223_s6 = inlined_call_operand.vmem [shape: f32[1,128], index: 6, kind: input, shape index: {}]   ;;  %s224_s5 = inlined_call_operand.vmem [shape: bf16[16,128], index: 5, kind: input, shape index: {}]   ;;  %s225_s7 = inlined_call_operand.vmem [shape: f32[8,128], index: 7, kind: output, shape index: {}]  }
   0x1   :  { %v29_v0 = vld [vmem:[%s218_s1] sm:$0xf]  ;;  %v146_v4 = vld [vmem:[%s222_s3 + $0x8] sm:$0xff] }
   0x2   :  { %v27_v1 = vld [vmem:[%s219_s0] sm:$0xff]  ;;  %v40_v2 = vsel %vm38_vm0, %v29_v0, 0  ;;  %87 = vmatpush.bf16.msra.mxu1 %v146_v4 }
   0x3   :  { %v28_v3 = vpack.c.bf16 %v27_v1, %v27_v1  ;;  %49 = vmatpush.bf16.msra.mxu0 %v40_v2  ;;  %v145_v5 = vld [vmem:[%s222_s3] sm:$0xff] }
   0x4   :  { %v148_v6 = vld [vmem:[%s220_s2] ss:$0 sm:$0xff] }
   0x5   :  { %v147_v12 = vld [vmem:[%s224_s5] sm:$0xff] }
   0x6   :  { %130 = vmatmul.msk.bf16.vlgmr.msra.gmra.mxu0 %vm34_vm1, %v28_v3  ;;  %88 = vmatpush.bf16.msra.mxu1 %v145_v5  ;;  %v149_v13 = vld [vmem:[%s221_s4] ss:$0 sm:$0xff] }
   0x7   :  { %119 = vmatpush.bf16.msra.mxu2 %v147_v12  ;;  %v150_v19 = vld [vmem:[%s223_s6] ss:$0 sm:$0xff] }
  0x83   :  { %v51_v7 = vpop.f32.mrf.mxu0 }
  0x84   :  { %v52_v8 = vadd.f32 %v148_v6, %v51_v7 }
  0x86   :  { %v55_v9 = vmax.f32 %v52_v8, 0.0 }
  0x88   :  { %v56_v10 = vpack.c.bf16 %v55_v9, %v55_v9 }
  0x8a   :  { %139 = vmatmul.msk.bf16.vlgmr.msra.gmra.mxu1 %vm77_vm2, %v56_v10 }
  0x8b   :  { %v53_v11 = vpop.f32.mrf.mxu0 }
 0x107   :  { %v90_v14 = vpop.f32.mrf.mxu1 }
 0x108   :  { %v91_v15 = vadd.f32 %v149_v13, %v90_v14 }
 0x10a   :  { %v94_v16 = vmax.f32 %v91_v15, 0.0 }
 0x10c   :  { %v95_v17 = vpack.c.bf16 %v94_v16, %v94_v16 }
 0x10e   :  { %144 = vmatmul.msk.bf16.vlgmr.msra.gmra.mxu2 %vm108_vm3, %v95_v17 }
 0x10f   :  { %v92_v18 = vpop.f32.mrf.mxu1 }
 0x191   :  { %v121_v20 = vpop.f32.mrf.mxu2 }
 0x192   :  { %v122_v21 = vadd.f32 %v150_v19, %v121_v20 }
 0x194   :  { %125 = vst [vmem:[%s225_s7] sm:$0xff] %v122_v21 }
 0x199   :  { %v123_v22 = vpop.f32.mrf.mxu2 }

</bundles_post_ra>
